<compile_context>
chip_gen: v7x
topology: tpu7x:2x2x1
jax: 0.10.0
libtpu: 0.0.40
codegen_flags: <defaults>
</compile_context>

<pallas_src>
import functools

import jax
import jax.numpy as jnp
from jax.experimental import pallas as pl
from jax.experimental.pallas import tpu as pltpu

INPUT_DIM = 28 * 28   # 784
HIDDEN_DIM = 100
OUTPUT_DIM = 10

HID_PAD = 128         # hidden dim padded to one full lane group


def _round_up(x, m):
    return ((x + m - 1) // m) * m


def _mlp_kernel(x_ref, w1_ref, b1_ref, w2_ref, b2_ref, out_ref):
    # In-kernel f32 -> bf16 cast of the activation tile (free: VALU slack,
    # kernel is DMA-bound on the f32 x read).
    x = x_ref[...].astype(w1_ref.dtype)
    # fc1: (tb, 784) @ (784, 128) -> f32 MXU accumulator; bias + ReLU in f32.
    h = jnp.dot(x, w1_ref[...], preferred_element_type=jnp.float32)
    h = jnp.maximum(h + b1_ref[...], 0.0)
    # fc2: cast back to bf16 for the MXU, accumulate f32, write narrow (10).
    o = jnp.dot(h.astype(w2_ref.dtype), w2_ref[...],
                preferred_element_type=jnp.float32)
    out_ref[...] = (o + b2_ref[...]).astype(out_ref.dtype)


def prepare_params(w1, b1, w2, b2, compute_dtype=jnp.bfloat16):
    """One-time weight prep (pad hidden dim to 128 lanes, cast to bf16).

    Zero padding is exact: padded hidden lanes are ReLU(0 + 0) = 0 and hit
    zero rows of w2, so they contribute nothing.
    """
    w1_p = jnp.zeros((INPUT_DIM, HID_PAD), compute_dtype).at[
        :, :HIDDEN_DIM].set(w1.astype(compute_dtype))
    b1_p = jnp.zeros((1, HID_PAD), jnp.float32).at[0, :HIDDEN_DIM].set(
        b1.astype(jnp.float32))
    w2_p = jnp.zeros((HID_PAD, OUTPUT_DIM), compute_dtype).at[
        :HIDDEN_DIM, :].set(w2.astype(compute_dtype))
    b2_p = b2.astype(jnp.float32).reshape(1, OUTPUT_DIM)
    return w1_p, b1_p, w2_p, b2_p


@functools.partial(jax.jit, static_argnames=("block_batch",))
def feedforward_forward(x, w1_p, b1_p, w2_p, b2_p, *, block_batch=1024):
    """Forward pass of FeedforwardNeuralNetModel.

    x:    (B, 784) float32
    w1_p: (784, 128) bf16   b1_p: (1, 128) f32   (from prepare_params)
    w2_p: (128, 10)  bf16   b2_p: (1, 10)  f32
    returns: (B, 10) float32
    """
    B = x.shape[0]

    # Balanced batch tiling.  Padding waste per tile is < 8 rows; ragged last
    # tiles are masked by Pallas (garbage rows never mix across rows and are
    # never written back).
    n_tiles = pl.cdiv(B, block_batch)
    if n_tiles > 1 and n_tiles % 2 == 1:
        n_tiles += 1                      # even count keeps both v7x TCs busy
    tb = _round_up(pl.cdiv(B, n_tiles), 8)
    n_tiles = pl.cdiv(B, tb)              # guard: no fully-empty trailing tile

    dsize = jnp.dtype(w1_p.dtype).itemsize
    cost = pl.CostEstimate(
        flops=2 * B * (INPUT_DIM * HID_PAD + HID_PAD * OUTPUT_DIM),
        transcendentals=0,
        bytes_accessed=(B * INPUT_DIM * 4          # f32 x read
                        + B * OUTPUT_DIM * 4       # f32 narrow output write
                        + INPUT_DIM * HID_PAD * dsize       # w1 (resident)
                        + HID_PAD * OUTPUT_DIM * dsize      # w2 (resident)
                        + (HID_PAD + OUTPUT_DIM) * 4),      # biases
    )

    out = pl.pallas_call(
        _mlp_kernel,
        out_shape=jax.ShapeDtypeStruct((B, OUTPUT_DIM), jnp.float32),
        grid=(n_tiles,),
        in_specs=[
            pl.BlockSpec((tb, INPUT_DIM), lambda i: (i, 0)),        # x tiles
            pl.BlockSpec((INPUT_DIM, HID_PAD), lambda i: (0, 0)),   # w1 resident
            pl.BlockSpec((1, HID_PAD), lambda i: (0, 0)),           # b1 resident
            pl.BlockSpec((HID_PAD, OUTPUT_DIM), lambda i: (0, 0)),  # w2 resident
            pl.BlockSpec((1, OUTPUT_DIM), lambda i: (0, 0)),        # b2 resident
        ],
        out_specs=pl.BlockSpec((tb, OUTPUT_DIM), lambda i: (i, 0)),
        compiler_params=pltpu.CompilerParams(
            dimension_semantics=("parallel",),
            vmem_limit_bytes=32 * 1024 * 1024),
        cost_estimate=cost,
    )(x, w1_p, b1_p, w2_p, b2_p)

    return out


def init_params(key):
    """Deterministic init mimicking nn.Linear's U(-1/sqrt(fan_in), 1/sqrt(fan_in))."""
    k1, k2, k3, k4 = jax.random.split(key, 4)
    bound1 = 1.0 / jnp.sqrt(INPUT_DIM)
    bound2 = 1.0 / jnp.sqrt(HIDDEN_DIM)
    # PyTorch stores weight as (out, in); we keep (in, out) for the kernel.
    w1 = jax.random.uniform(k1, (INPUT_DIM, HIDDEN_DIM), jnp.float32,
                            -bound1, bound1)
    b1 = jax.random.uniform(k2, (HIDDEN_DIM,), jnp.float32, -bound1, bound1)
    w2 = jax.random.uniform(k3, (HIDDEN_DIM, OUTPUT_DIM), jnp.float32,
                            -bound2, bound2)
    b2 = jax.random.uniform(k4, (OUTPUT_DIM,), jnp.float32, -bound2, bound2)
    return w1, b1, w2, b2


if __name__ == "__main__":
    key = jax.random.PRNGKey(0)
    k_x, k_p = jax.random.split(key)

    batch = 8
    x = jax.random.normal(k_x, (batch, INPUT_DIM), jnp.float32)
    w1, b1, w2, b2 = init_params(k_p)

    # Hoisted one-time weight prep (pad + bf16 cast), then the kernel call.
    params = prepare_params(w1, b1, w2, b2)
    params = jax.block_until_ready(params)

    out = feedforward_forward(x, *params)
    out = jax.block_until_ready(out)
    assert out.shape == (batch, OUTPUT_DIM)

    # Pure-JAX reference mirroring the kernel's numerics (bf16 matmul inputs,
    # f32 accumulation, f32 bias adds).
    f32 = jnp.float32
    hi = jax.lax.Precision.HIGHEST
    xc = x.astype(jnp.bfloat16).astype(f32)
    w1c = w1.astype(jnp.bfloat16).astype(f32)
    w2c = w2.astype(jnp.bfloat16).astype(f32)
    h = jnp.maximum(jnp.dot(xc, w1c, precision=hi) + b1, 0.0)
    hc = h.astype(jnp.bfloat16).astype(f32)
    ref = jnp.dot(hc, w2c, precision=hi) + b2
    assert jnp.allclose(out, ref, atol=2e-2, rtol=2e-2), (
        float(jnp.max(jnp.abs(out - ref))))

    print("KERNEL_OK")
</pallas_src>

<mosaic_0001>
module attributes {stable_mosaic.version = 11 : i64} {
  func.func @_mlp_kernel(%arg0: i32, %arg1: memref<8x784xf32, #tpu.memory_space<vmem>>, %arg2: memref<784x128xbf16, #tpu.memory_space<vmem>>, %arg3: memref<1x128xf32, #tpu.memory_space<vmem>>, %arg4: memref<128x10xbf16, #tpu.memory_space<vmem>>, %arg5: memref<1x10xf32, #tpu.memory_space<vmem>>, %arg6: memref<8x10xf32, #tpu.memory_space<vmem>>) attributes {dimension_semantics = [#tpu.dimension_semantics<parallel>], iteration_bounds = array<i64: 1>, scalar_prefetch = 0 : i64, scratch_operands = 0 : i64, tpu.core_type = #tpu.core_type<tc>, window_params = [{transform_indices = @transform_0, window_bounds = array<i64: 8, 784>}, {pipeline_mode = #tpu.pipeline_mode<synchronous>, transform_indices = @transform_1, window_bounds = array<i64: 784, 128>}, {pipeline_mode = #tpu.pipeline_mode<synchronous>, transform_indices = @transform_2, window_bounds = array<i64: 1, 128>}, {pipeline_mode = #tpu.pipeline_mode<synchronous>, transform_indices = @transform_3, window_bounds = array<i64: 128, 10>}, {pipeline_mode = #tpu.pipeline_mode<synchronous>, transform_indices = @transform_4, window_bounds = array<i64: 1, 10>}, {transform_indices = @transform_5, window_bounds = array<i64: 8, 10>}]} {
    %c0 = arith.constant 0 : index
    %c0_0 = arith.constant 0 : index
    %0 = vector.load %arg1[%c0, %c0_0] : memref<8x784xf32, #tpu.memory_space<vmem>>, vector<8x784xf32>
    %1 = arith.truncf %0 : vector<8x784xf32> to vector<8x784xbf16>
    %c0_1 = arith.constant 0 : index
    %c0_2 = arith.constant 0 : index
    %2 = vector.load %arg2[%c0_1, %c0_2] : memref<784x128xbf16, #tpu.memory_space<vmem>>, vector<784x128xbf16>
    %cst = arith.constant dense<0.000000e+00> : vector<8x128xf32>
    %3 = tpu.matmul %1, %2, %cst {dimension_numbers = #tpu.dot_dimension_numbers<[1], [0], [0], [1], [0, 0, 1, 1], [], []>} : vector<8x784xbf16>, vector<784x128xbf16>, vector<8x128xf32> -> vector<8x128xf32>
    %c0_3 = arith.constant 0 : index
    %c0_4 = arith.constant 0 : index
    %4 = vector.load %arg3[%c0_3, %c0_4] : memref<1x128xf32, #tpu.memory_space<vmem>>, vector<1x128xf32>
    %5 = vector.broadcast %4 : vector<1x128xf32> to vector<8x128xf32>
    %6 = arith.addf %3, %5 : vector<8x128xf32>
    %cst_5 = arith.constant 0.000000e+00 : f32
    %7 = vector.broadcast %cst_5 : f32 to vector<8x128xf32>
    %8 = arith.maximumf %6, %7 : vector<8x128xf32>
    %9 = arith.truncf %8 : vector<8x128xf32> to vector<8x128xbf16>
    %c0_6 = arith.constant 0 : index
    %c0_7 = arith.constant 0 : index
    %10 = vector.load %arg4[%c0_6, %c0_7] : memref<128x10xbf16, #tpu.memory_space<vmem>>, vector<128x10xbf16>
    %cst_8 = arith.constant dense<0.000000e+00> : vector<8x10xf32>
    %11 = tpu.matmul %9, %10, %cst_8 {dimension_numbers = #tpu.dot_dimension_numbers<[1], [0], [0], [1], [0, 0, 1, 1], [], []>} : vector<8x128xbf16>, vector<128x10xbf16>, vector<8x10xf32> -> vector<8x10xf32>
    %c0_9 = arith.constant 0 : index
    %c0_10 = arith.constant 0 : index
    %12 = vector.load %arg5[%c0_9, %c0_10] : memref<1x10xf32, #tpu.memory_space<vmem>>, vector<1x10xf32>
    %13 = vector.broadcast %12 : vector<1x10xf32> to vector<8x10xf32>
    %14 = arith.addf %11, %13 : vector<8x10xf32>
    %c0_11 = arith.constant 0 : index
    %c0_12 = arith.constant 0 : index
    %15 = vector.load %arg6[%c0_11, %c0_12] : memref<8x10xf32, #tpu.memory_space<vmem>>, vector<8x10xf32>
    tpu.vector_store %arg6[%c0_11, %c0_12], %14 {strides = array<i32>} : memref<8x10xf32, #tpu.memory_space<vmem>>, vector<8x10xf32>,
    return
  }
  func.func @transform_0(%arg0: i32) -> (i32, i32) {
    %c0_i32 = arith.constant 0 : i32
    %c0_i32_0 = arith.constant 0 : i32
    return %arg0, %c0_i32 : i32, i32
  }
  func.func @transform_1(%arg0: i32) -> (i32, i32) {
    %c0_i32 = arith.constant 0 : i32
    %c0_i32_0 = arith.constant 0 : i32
    %c0_i32_1 = arith.constant 0 : i32
    return %c0_i32, %c0_i32_0 : i32, i32
  }
  func.func @transform_2(%arg0: i32) -> (i32, i32) {
    %c0_i32 = arith.constant 0 : i32
    %c0_i32_0 = arith.constant 0 : i32
    %c0_i32_1 = arith.constant 0 : i32
    return %c0_i32, %c0_i32_0 : i32, i32
  }
  func.func @transform_3(%arg0: i32) -> (i32, i32) {
    %c0_i32 = arith.constant 0 : i32
    %c0_i32_0 = arith.constant 0 : i32
    %c0_i32_1 = arith.constant 0 : i32
    return %c0_i32, %c0_i32_0 : i32, i32
  }
  func.func @transform_4(%arg0: i32) -> (i32, i32) {
    %c0_i32 = arith.constant 0 : i32
    %c0_i32_0 = arith.constant 0 : i32
    %c0_i32_1 = arith.constant 0 : i32
    return %c0_i32, %c0_i32_0 : i32, i32
  }
  func.func @transform_5(%arg0: i32) -> (i32, i32) {
    %c0_i32 = arith.constant 0 : i32
    %c0_i32_0 = arith.constant 0 : i32
    return %arg0, %c0_i32 : i32, i32
  }
}

</mosaic_0001>

<bundles_post_ra>
// kernel: feedforward_forward.1
= control target key start
LH: loop header
LB: loop body
LE: loop exit
PB: predicated region body
PF: predicated region fallthrough
CT: control target
= control target key end

     0   :  { %10 = vsyncpa [#allocation3], 0  ;;  %s1141_s0 = inlined_call_operand.vmem [shape: f32[8,784], index: 0, kind: input, shape index: {}]   ;;  %s1142_s1 = inlined_call_operand.hbm [shape: bf16[784,128], index: 1, kind: input, shape index: {}]   ;;  %s1143_s2 = inlined_call_operand.vmem [shape: f32[1,128], index: 2, kind: input, shape index: {}]   ;;  %s1144_s3 = inlined_call_operand.vmem [shape: bf16[128,10], index: 3, kind: input, shape index: {}]   ;;  %s1145_s4 = inlined_call_operand.vmem [shape: f32[1,10], index: 4, kind: input, shape index: {}]   ;;  %s1146_s5 = inlined_call_operand.hbm [shape: f32[8,10], index: 5, kind: output, shape index: {}]  }
   0x1   :  { %11 = vsyncpa [#allocation4], 0  ;;  %s1017_s18 = smov [#allocation2]   ;;  %s969_s22 = scalar_lea.hbm %s1142_s1, 6272 }
   0x2   :  { %s19_s19 = sshll.u32 %s1017_s18, 4  ;;  %p970_p0 = scmp.ne.s32.totalorder %s1142_s1, %s969_s22  ;;  %s20_s19 = int_to_ptr.vmem [resolvable:$true] %s19_s19 }
   0x3   :  { %p973_p1 = scmp.lt.u32.totalorder %s969_s22, %s1142_s1 }
   0x5   :  { %p975_p2 = pnand %p973_p1, %p970_p0 }
   0x7   :  { %978 = shalt.err (!%p975_p2)
}
   0x8   :  { %s979_s27 = scalar_lea.vmem %s20_s19, 6272  ;;  %p984_p4 = scmp.lt.s32.totalorder %s20_s19, %s20_s19 }
   0x9   :  { %p980_p3 = scmp.ne.s32.totalorder %s20_s19, %s979_s27  ;;  %p985_p5 = scmp.lt.s32.totalorder %s979_s27, %s979_s27 }
   0xb   :  { %p986_p6 = por %p985_p5, %p984_p4 }
   0xd   :  { %p987_p7 = pnand %p986_p6, %p980_p3 }
   0xf   :  { %990 = shalt.err (!%p987_p7)
}
  0x10   :  { %s1018_s28 = smov 64   ;;  %s1019_s29 = smov 4  }
  0x11   :  { %25 = dma.hbm_to_vmem [thread:$0]  %s1142_s1, 6272, %s20_s19, [#allocation3], %s1018_s28, %s1018_s28, %s1019_s29  }
  0x12   :  { %1013 = dma.done.wait [#allocation3], 6272  }
  0x13   :  { %1014 = vsyncadd [#allocation3], 4294961024  ;;  %v912_v0 = vld [vmem:[#allocation2 + $0x40] sm:$0xff]   ;;  %v916_v4 = vld [vmem:[#allocation2 + $0x48] sm:$0xff]   ;;  %v1020_v44 = vmov 0.0   ;;  %vm1021_vm0 = vmmov 0  }
  0x14   :  { %v913_v1 = vld [vmem:[#allocation2] sm:$0xff]   ;;  %803 = vmatprep.subr.bf16.mxu0 %v912_v0  ;;  %v917_v5 = vld [vmem:[#allocation2 + $0x8] sm:$0xff]   ;;  %v920_v8 = vld [vmem:[#allocation2 + $0x50] sm:$0xff]   ;;  %vm449_vm1 = vcmask 130048   ;;  %s1022_s11 = smov [#allocation5]   ;;  %vm726_vm2 = vcmask 80896  }
  0x15   :  { %v914_v2 = vld [vmem:[#allocation2 + $0xc0] sm:$0xff]   ;;  %804 = vmatpush3.bf16.msra.mxu0 %v913_v1  ;;  %v918_v6 = vld [vmem:[#allocation2 + $0xc8] sm:$0xff]   ;;  %v921_v9 = vld [vmem:[#allocation2 + $0x10] sm:$0xff]   ;;  %s734_s12 = sshll.u32 %s1022_s11, 4  ;;  %s735_s12 = int_to_ptr.vmem [resolvable:$true] %s734_s12 }
  0x16   :  { %v915_v3 = vld [vmem:[#allocation2 + $0x80] sm:$0xff]   ;;  %825 = vmatprep.subr.bf16.mxu1 %v914_v2  ;;  %805 = vmatprep.subr.bf16.mxu0 %v916_v4  ;;  %v919_v7 = vld [vmem:[#allocation2 + $0x88] sm:$0xff]   ;;  %v922_v10 = vld [vmem:[#allocation2 + $0xd0] sm:$0xff]   ;;  %s991_s13 = scalar_lea.vmem %s735_s12, 128  ;;  %p996_p9 = scmp.lt.s32.totalorder %s735_s12, %s735_s12 }
  0x17   :  { %826 = vmatpush3.bf16.msra.mxu1 %v915_v3  ;;  %v923_v11 = vld [vmem:[#allocation2 + $0x90] sm:$0xff]   ;;  %v924_v12 = vld [vmem:[#allocation2 + $0x58] sm:$0xff]   ;;  %v928_v16 = vld [vmem:[#allocation2 + $0x60] sm:$0xff]   ;;  %p992_p8 = scmp.ne.s32.totalorder %s735_s12, %s991_s13  ;;  %p997_p10 = scmp.lt.s32.totalorder %s991_s13, %s991_s13 }
  0x18   :  { %827 = vmatprep.subr.bf16.mxu1 %v918_v6  ;;  %v925_v13 = vld [vmem:[#allocation2 + $0x18] sm:$0xff]   ;;  %v929_v17 = vld [vmem:[#allocation2 + $0x20] sm:$0xff]   ;;  %v932_v20 = vld [vmem:[#allocation2 + $0x68] sm:$0xff]  }
  0x19   :  { %806 = vmatpush3.bf16.msra.mxu0 %v917_v5  ;;  %v926_v14 = vld [vmem:[#allocation2 + $0xd8] sm:$0xff]   ;;  %v930_v18 = vld [vmem:[#allocation2 + $0xe0] sm:$0xff]   ;;  %v933_v21 = vld [vmem:[#allocation2 + $0x28] sm:$0xff]   ;;  %p998_p11 = por %p997_p10, %p996_p9 }
  0x1a   :  { %807 = vmatprep.subr.bf16.mxu0 %v920_v8  ;;  %v927_v15 = vld [vmem:[#allocation2 + $0x98] sm:$0xff]   ;;  %v931_v19 = vld [vmem:[#allocation2 + $0xa0] sm:$0xff]   ;;  %v934_v22 = vld [vmem:[#allocation2 + $0xe8] sm:$0xff]  }
  0x1b   :  { %828 = vmatpush3.bf16.msra.mxu1 %v919_v7  ;;  %v935_v23 = vld [vmem:[#allocation2 + $0xa8] sm:$0xff]   ;;  %v936_v24 = vld [vmem:[#allocation2 + $0x70] sm:$0xff]   ;;  %v940_v28 = vld [vmem:[#allocation2 + $0x78] sm:$0xff]   ;;  %p999_p12 = pnand %p998_p11, %p992_p8 }
  0x1c   :  { %829 = vmatprep.subr.bf16.mxu1 %v922_v10  ;;  %v937_v25 = vld [vmem:[#allocation2 + $0x30] sm:$0xff]   ;;  %v941_v29 = vld [vmem:[#allocation2 + $0x38] sm:$0xff]   ;;  %v37_v31 = vld [vmem:[%s1141_s0 + $0x8] sm:$0xff] }
  0x1d   :  { %808 = vmatpush3.bf16.msra.mxu0 %v921_v9  ;;  %v938_v26 = vld [vmem:[#allocation2 + $0xf0] sm:$0xff]   ;;  %v942_v30 = vld [vmem:[#allocation2 + $0xf8] sm:$0xff]   ;;  %v44_v32 = vpack.c.bf16 %v37_v31, %v37_v31  ;;  %v36_v34 = vld [vmem:[%s1141_s0] sm:$0xff] }
  0x1e   :  { %809 = vmatprep.subr.bf16.mxu0 %v924_v12  ;;  %v939_v27 = vld [vmem:[#allocation2 + $0xb0] sm:$0xff]   ;;  %v943_v33 = vld [vmem:[#allocation2 + $0xb8] sm:$0xff]   ;;  %v43_v35 = vpack.c.bf16 %v36_v34, %v36_v34  ;;  %v944_v36 = vld [vmem:[#allocation2 + $0x140] sm:$0xff]  }
  0x1f   :  { %830 = vmatpush3.bf16.msra.mxu1 %v923_v11  ;;  %v39_v37 = vld [vmem:[%s1141_s0 + $0x18] sm:$0xff]  ;;  %485 = vmatprep.mubr.bf16.mxu0 %v44_v32  ;;  %v945_v39 = vld [vmem:[#allocation2 + $0x100] sm:$0xff]   ;;  %v38_v40 = vld [vmem:[%s1141_s0 + $0x10] sm:$0xff] }
  0x20   :  { %831 = vmatprep.subr.bf16.mxu1 %v926_v14  ;;  %v46_v38 = vpack.c.bf16 %v39_v37, %v39_v37  ;;  %v45_v41 = vpack.c.bf16 %v38_v40, %v38_v40  ;;  %v946_v42 = vld [vmem:[#allocation2 + $0x148] sm:$0xff]   ;;  %v948_v45 = vld [vmem:[#allocation2 + $0x150] sm:$0xff]   ;;  %v950_v47 = vld [vmem:[#allocation2 + $0x158] sm:$0xff]  }
  0x21   :  { %810 = vmatpush3.bf16.msra.mxu0 %v925_v13  ;;  %v947_v43 = vld [vmem:[#allocation2 + $0x108] sm:$0xff]   ;;  %v949_v46 = vld [vmem:[#allocation2 + $0x110] sm:$0xff]   ;;  %v951_v48 = vld [vmem:[#allocation2 + $0x118] sm:$0xff]  }
  0x22   :  { %811 = vmatprep.subr.bf16.mxu0 %v928_v16  ;;  %525 = vmatprep.mubr.bf16.mxu1 %v46_v38  ;;  %v952_v49 = vld [vmem:[#allocation2 + $0x160] sm:$0xff]   ;;  %v954_v51 = vld [vmem:[#allocation2 + $0x168] sm:$0xff]   ;;  %v956_v55 = vld [vmem:[#allocation2 + $0x170] sm:$0xff]  }
  0x23   :  { %832 = vmatpush3.bf16.msra.mxu1 %v927_v15  ;;  %v953_v50 = vld [vmem:[#allocation2 + $0x120] sm:$0xff]   ;;  %v955_v52 = vld [vmem:[#allocation2 + $0x128] sm:$0xff]   ;;  %v42_v57 = vld [vmem:[%s1141_s0 + $0x30] sm:$0xff] }
  0x24   :  { %833 = vmatprep.subr.bf16.mxu1 %v930_v18  ;;  %v960_v53 = vld [vmem:[#allocation2 + $0x180] sm:$0xff]   ;;  %v41_v54 = vld [vmem:[%s1141_s0 + $0x28] sm:$0xff]  ;;  %v49_v58 = vpack.c.bf16 %v42_v57, %v42_v57  ;;  %v957_v59 = vld [vmem:[#allocation2 + $0x130] sm:$0xff]  }
  0x25   :  { %812 = vmatpush3.bf16.msra.mxu0 %v929_v17  ;;  %v48_v56 = vpack.c.bf16 %v41_v54, %v41_v54  ;;  %v958_v60 = vld [vmem:[#allocation2 + $0x178] sm:$0xff]   ;;  %v40_v62 = vld [vmem:[%s1141_s0 + $0x20] sm:$0xff]  ;;  %v962_v1 = vld [vmem:[%s1144_s3 + $0x8] sm:$0xff]  }
  0x26   :  { %813 = vmatprep.subr.bf16.mxu0 %v932_v20  ;;  %v959_v61 = vld [vmem:[#allocation2 + $0x138] sm:$0xff]   ;;  %v47_v63 = vpack.c.bf16 %v40_v62, %v40_v62  ;;  %v961_v0 = vld [vmem:[%s1144_s3] sm:$0xff]   ;;  %v963_v2 = vld [vmem:[%s1144_s3 + $0x10] sm:$0xff]  }
  0x27   :  { %834 = vmatpush3.bf16.msra.mxu1 %v931_v19  ;;  %v964_v3 = vld [vmem:[%s1144_s3 + $0x18] sm:$0xff]   ;;  %v965_v4 = vld [vmem:[%s1144_s3 + $0x20] sm:$0xff]   ;;  %v966_v5 = vld [vmem:[%s1144_s3 + $0x28] sm:$0xff]  }
  0x28   :  { %835 = vmatprep.subr.bf16.mxu1 %v934_v22  ;;  %v967_v6 = vld [vmem:[%s1144_s3 + $0x30] sm:$0xff]   ;;  %v968_v7 = vld [vmem:[%s1144_s3 + $0x38] sm:$0xff]   ;;  %v743_v9 = vld [vmem:[%s1143_s2] ss:$0 sm:$0xff] }
  0x29   :  { %814 = vmatpush3.bf16.msra.mxu0 %v933_v21  ;;  %v794_v34 = vld [vmem:[%s1145_s4] ss:$0 sm:$0xff] }
  0x2a   :  { %815 = vmatprep.subr.bf16.mxu0 %v936_v24 }
  0x2b   :  { %836 = vmatpush3.bf16.msra.mxu1 %v935_v23 }
  0x2c   :  { %837 = vmatprep.subr.bf16.mxu1 %v938_v26 }
  0x2d   :  { %816 = vmatpush3.bf16.msra.mxu0 %v937_v25 }
  0x2e   :  { %817 = vmatprep.subr.bf16.mxu0 %v940_v28 }
  0x2f   :  { %838 = vmatpush3.bf16.msra.mxu1 %v939_v27 }
  0x30   :  { %839 = vmatprep.subr.bf16.mxu1 %v942_v30 }
  0x31   :  { %818 = vmatpush3.bf16.msra.mxu0 %v941_v29 }
  0x32   :  { %847 = vmatprep.subr.bf16.mxu0 %v944_v36 }
  0x33   :  { %840 = vmatpush3.bf16.msra.mxu1 %v943_v33 }
  0x34   :  { %486 = vmatmul.mubr.bf16.vlgmr.msra.gmra.mrb[0].mxu0 %v43_v35  ;;  %880 = vmatprep.subr.bf16.mxu1 %v1020_v44 }
  0x35   :  { %848 = vmatpush3.bf16.msra.mxu0 %v945_v39  ;;  %565 = vmatprep.mubr.bf16.mxu0 %v48_v56 }
  0x36   :  { %526 = vmatmul.mubr.bf16.vlgmr.msra.gmra.mrb[0].mxu1 %v45_v41  ;;  %849 = vmatprep.subr.bf16.mxu0 %v946_v42 }
  0x37   :  { %882 = vmatprep.mubr.msk.bf16.mxu1 %vm1021_vm0, %v1020_v44  ;;  %881 = vmatpush3.bf16.msra.mxu1 %v960_v53 }
  0x38   :  { %886 = vmatprep.subr.bf16.mxu1 %v1020_v44 }
  0x39   :  { %850 = vmatpush3.bf16.msra.mxu0 %v947_v43 }
  0x3a   :  { %851 = vmatprep.subr.bf16.mxu0 %v948_v45 }
  0x3d   :  { %852 = vmatpush3.bf16.msra.mxu0 %v949_v46 }
  0x3e   :  { %853 = vmatprep.subr.bf16.mxu0 %v950_v47  ;;  %883 = vmatmul.mubr.msk.bf16.vlgmr.msra.gmra.mrb[4].mxu1 %vm449_vm1, %v49_v58 }
  0x3f   :  { %902 = vmatprep.mubr.msk.bf16.mxu1 %vm1021_vm0, %v1020_v44  ;;  %887 = vmatpush3.bf16.msra.mxu1 %v961_v0 }
  0x40   :  { %888 = vmatprep.subr.bf16.mxu1 %v1020_v44 }
  0x41   :  { %854 = vmatpush3.bf16.msra.mxu0 %v951_v48 }
  0x42   :  { %855 = vmatprep.subr.bf16.mxu0 %v952_v49 }
  0x43   :  { %889 = vmatpush3.bf16.msra.mxu1 %v962_v1 }
  0x44   :  { %890 = vmatprep.subr.bf16.mxu1 %v1020_v44 }
  0x45   :  { %856 = vmatpush3.bf16.msra.mxu0 %v953_v50 }
  0x46   :  { %857 = vmatprep.subr.bf16.mxu0 %v954_v51 }
  0x47   :  { %891 = vmatpush3.bf16.msra.mxu1 %v963_v2 }
  0x48   :  { %892 = vmatprep.subr.bf16.mxu1 %v1020_v44 }
  0x49   :  { %858 = vmatpush3.bf16.msra.mxu0 %v955_v52 }
  0x4a   :  { %859 = vmatprep.subr.bf16.mxu0 %v956_v55 }
  0x4b   :  { %893 = vmatpush3.bf16.msra.mxu1 %v964_v3 }
  0x4c   :  { %894 = vmatprep.subr.bf16.mxu1 %v1020_v44 }
  0x4d   :  { %860 = vmatpush3.bf16.msra.mxu0 %v957_v59 }
  0x4e   :  { %861 = vmatprep.subr.bf16.mxu0 %v958_v60 }
  0x4f   :  { %895 = vmatpush3.bf16.msra.mxu1 %v965_v4 }
  0x50   :  { %896 = vmatprep.subr.bf16.mxu1 %v1020_v44 }
  0x51   :  { %862 = vmatpush3.bf16.msra.mxu0 %v959_v61 }
  0x53   :  { %897 = vmatpush3.bf16.msra.mxu1 %v966_v5 }
  0x54   :  { %566 = vmatmul.mubr.bf16.vlgmr.msra.gmra.mrb[4].mxu0 %v47_v63  ;;  %898 = vmatprep.subr.bf16.mxu1 %v1020_v44 }
  0x57   :  { %899 = vmatpush3.bf16.msra.mxu1 %v967_v6 }
  0x58   :  { %900 = vmatprep.subr.bf16.mxu1 %v1020_v44 }
  0x5b   :  { %901 = vmatpush3.bf16.msra.mxu1 %v968_v7 }
 0x107   :  { %v819_v8 = vpop.f32.mrb[0].mxu0 }
 0x108   :  { %v820_v10 = vpop.f32.mrb[1].mxu0 }
 0x109   :  { %v821_v11 = vadd.f32 %v820_v10, %v819_v8  ;;  %v822_v12 = vpop.f32.mrb[2].mxu0  ;;  %v841_v13 = vpop.f32.mrb[0].mxu1 }
 0x10a   :  { %v823_v14 = vpop.f32.mrb[3].mxu0  ;;  %v842_v16 = vpop.f32.mrb[1].mxu1 }
 0x10b   :  { %v488_v15 = vadd.f32 %v821_v11, %v743_v9  ;;  %v843_v17 = vadd.f32 %v842_v16, %v841_v13  ;;  %v844_v18 = vpop.f32.mrb[2].mxu1 }
 0x10c   :  { %v845_v19 = vpop.f32.mrb[3].mxu1 }
 0x10d   :  { %v528_v20 = vadd.f32 %v843_v17, %v488_v15 }
 0x111   :  { %v607_v21 = vpop.f32.mrb[4].mxu1 }
 0x112   :  { %v884_v22 = vpop.f32.mrb[5].mxu1 }
 0x113   :  { %v610_v23 = vpop.f32.mrb[6].mxu1 }
 0x114   :  { %v885_v24 = vpop.f32.mrb[7].mxu1 }
 0x127   :  { %v863_v25 = vpop.f32.mrb[4].mxu0 }
 0x128   :  { %v864_v26 = vpop.f32.mrb[5].mxu0 }
 0x129   :  { %v865_v27 = vadd.f32 %v864_v26, %v863_v25  ;;  %v866_v28 = vpop.f32.mrb[6].mxu0 }
 0x12a   :  { %v867_v29 = vpop.f32.mrb[7].mxu0 }
 0x12b   :  { %v568_v30 = vadd.f32 %v865_v27, %v528_v20 }
 0x12d   :  { %v608_v31 = vadd.f32 %v607_v21, %v568_v30 }
 0x12f   :  { %v613_v32 = vmax.f32 %v608_v31, 0.0 }
 0x131   :  { %v614_v33 = vpack.c.bf16 %v613_v32, %v613_v32 }
 0x133   :  { %903 = vmatmul.mubr.bf16.vlgmr.msra.gmra.mrb[8].mxu1 %v614_v33 }
 0x206   :  { %v720_v35 = vpop.f32.mrb[8].mxu1 }
 0x207   :  { %v721_v36 = vadd.f32 %v794_v34, %v720_v35  ;;  %v904_v37 = vpop.f32.mrb[9].mxu1 }
 0x208   :  { %v723_v38 = vpop.f32.mrb[10].mxu1 }
 0x209   :  { %v905_v39 = vpop.f32.mrb[11].mxu1  ;;  %727 = vst.msk [vmem:[#allocation5] sm:$0xff] %vm726_vm2, %v721_v36 }
 0x20a   :  { %1002 = shalt.err (!%p999_p12)
}
 0x20b   :  { %s1003_s4 = scalar_lea.hbm %s1146_s5, 128 }
 0x20c   :  { %p1004_p13 = scmp.ne.s32.totalorder %s1146_s5, %s1003_s4  ;;  %p1007_p0 = scmp.lt.u32.totalorder %s1003_s4, %s1146_s5 }
 0x20e   :  { %p1009_p1 = pnand %p1007_p0, %p1004_p13 }
 0x210   :  { %1012 = shalt.err (!%p1009_p1)
}
 0x211   :  { %737 = dma.vmem_to_hbm [thread:$0]  %s735_s12, 128, %s1146_s5, [#allocation4]  }
 0x212   :  { %1015 = dma.done.wait [#allocation4], 128  }
 0x213   :  { %1016 = vsyncadd [#allocation4], 4294967168 }
 0x214   :  { %741 = vsyncpa [#allocation3], 1 }
 0x215   :  { %742 = vsyncpa [#allocation4], 1 }

</bundles_post_ra>
